<compile_context>
chip_gen: v6e
topology: v6e:2x2x1
jax: 0.10.0
libtpu: 0.0.40
codegen_flags: <defaults>
</compile_context>

<pallas_src>
import math
from functools import partial

import jax
import jax.numpy as jnp
from jax.experimental import pallas as pl
from jax.experimental.pallas import tpu as pltpu

_INV_SQRT2 = 1.0 / math.sqrt(2.0)
_LN_EPS = 1e-5


def _round_up(x, m):
    return ((x + m - 1) // m) * m


def _temporal_projector_kernel(x_ref, w1_ref, b1_ref, w2_ref, b2_ref,
                               gamma_ref, beta_ref, o_ref):
    # x_ref:   (TILE_N, 1)   temporal scalar per row
    # w1_ref:  (1, H) f32    first linear weight (in, out)
    # b1_ref:  (1, H) f32
    # w2_ref:  (H, D) bf16   second linear weight (in, out), resident in VMEM
    # b2_ref:  (1, D) f32
    # gamma_ref/beta_ref: (1, D) f32  LayerNorm affine
    # o_ref:   (TILE_N, D) f32
    x = x_ref[...].astype(jnp.float32)                      # (TILE_N, 1)
    w1 = w1_ref[...].astype(jnp.float32)                    # (1, H)
    b1 = b1_ref[...].astype(jnp.float32)                    # (1, H)

    # Linear(1 -> H): K == 1, so this is a broadcast multiply (skip MXU).
    h = x * w1 + b1                                         # (TILE_N, H)

    # Exact (erf-based) GELU, matching torch.nn.GELU() default.
    h = 0.5 * h * (1.0 + jax.lax.erf(h * _INV_SQRT2))

    # Linear(H -> D) on the MXU: bf16 inputs, f32 accumulation.
    y = jnp.dot(h.astype(jnp.bfloat16), w2_ref[...],
                preferred_element_type=jnp.float32)         # (TILE_N, D)
    y = y + b2_ref[...].astype(jnp.float32)

    # LayerNorm over last dim (biased variance, eps = 1e-5), affine, in f32.
    mean = jnp.mean(y, axis=-1, keepdims=True)
    centered = y - mean
    var = jnp.mean(centered * centered, axis=-1, keepdims=True)
    inv_std = jax.lax.rsqrt(var + _LN_EPS)
    out = centered * inv_std * gamma_ref[...].astype(jnp.float32) \
          + beta_ref[...].astype(jnp.float32)

    o_ref[...] = out.astype(o_ref.dtype)


def temporal_projector(x, params, *, tile_n=256):
    """x: (..., 1) float32 -> (..., llm_size) float32."""
    w1, b1, w2, b2, gamma, beta = params
    hidden, llm_size = w2.shape
    lead_shape = x.shape[:-1]
    n_rows = math.prod(lead_shape) if lead_shape else 1
    x2d = x.reshape(n_rows, 1)

    # Row tile: multiple of 8 (sublane), capped at `tile_n`, no bigger than the
    # (padded) problem. D stays untiled -> lane-dense output stores.
    tile_rows = min(tile_n, _round_up(n_rows, 8))
    tile_rows = max(8, (tile_rows // 8) * 8)
    padded_n = _round_up(n_rows, tile_rows)
    if padded_n != n_rows:
        x2d = jnp.pad(x2d, ((0, padded_n - n_rows), (0, 0)))

    # Feed the MXU bf16 and halve the resident weight footprint in VMEM/HBM.
    w2_bf16 = w2.astype(jnp.bfloat16)

    grid = (padded_n // tile_rows,)
    const = lambda i: (0, 0)  # weights: same block every step -> stay resident

    out2d = pl.pallas_call(
        _temporal_projector_kernel,
        out_shape=jax.ShapeDtypeStruct((padded_n, llm_size), jnp.float32),
        grid=grid,
        in_specs=[
            pl.BlockSpec((tile_rows, 1), lambda i: (i, 0)),        # x tile
            pl.BlockSpec((1, hidden), const),                      # w1
            pl.BlockSpec((1, hidden), const),                      # b1
            pl.BlockSpec((hidden, llm_size), const),               # w2 (bf16)
            pl.BlockSpec((1, llm_size), const),                    # b2
            pl.BlockSpec((1, llm_size), const),                    # gamma
            pl.BlockSpec((1, llm_size), const),                    # beta
        ],
        out_specs=pl.BlockSpec((tile_rows, llm_size), lambda i: (i, 0)),
        compiler_params=pltpu.CompilerParams(
            dimension_semantics=("parallel",),          # megacore on v7x
            vmem_limit_bytes=64 * 1024 * 1024,          # explicit scoped VMEM
        ),
    )(x2d, w1, b1, w2_bf16, b2, gamma, beta)

    out2d = out2d[:n_rows]
    return out2d.reshape(*lead_shape, llm_size)


def init_params(key, llm_size):
    """Deterministic synthetic init matching nn.Linear / nn.LayerNorm shapes."""
    hidden = llm_size // 4
    k1, k2, k3, k4 = jax.random.split(key, 4)
    # nn.Linear(1, hidden): weight (hidden, 1), bias (hidden,). Stored as (in, out).
    bound1 = 1.0
    w1 = jax.random.uniform(k1, (1, hidden), jnp.float32, -bound1, bound1)
    b1 = jax.random.uniform(k2, (1, hidden), jnp.float32, -bound1, bound1)
    # nn.Linear(hidden, llm_size): weight (llm_size, hidden), bias (llm_size,).
    bound2 = 1.0 / math.sqrt(hidden)
    w2 = jax.random.uniform(k3, (hidden, llm_size), jnp.float32, -bound2, bound2)
    b2 = jax.random.uniform(k4, (1, llm_size), jnp.float32, -bound2, bound2)
    # nn.LayerNorm(llm_size): gamma=1, beta=0.
    gamma = jnp.ones((1, llm_size), jnp.float32)
    beta = jnp.zeros((1, llm_size), jnp.float32)
    return (w1, b1, w2, b2, gamma, beta)


def _reference(x, params):
    """Pure-JAX f32 reference for correctness checking."""
    w1, b1, w2, b2, gamma, beta = params
    h = x @ w1 + b1
    h = 0.5 * h * (1.0 + jax.lax.erf(h * _INV_SQRT2))
    y = h @ w2 + b2
    mean = jnp.mean(y, axis=-1, keepdims=True)
    var = jnp.mean((y - mean) ** 2, axis=-1, keepdims=True)
    return (y - mean) * jax.lax.rsqrt(var + _LN_EPS) * gamma + beta


if __name__ == "__main__":
    llm_size = 32          # -> hidden = 8
    batch, seq = 2, 8      # N = 16 rows

    key = jax.random.PRNGKey(0)
    k_param, k_x = jax.random.split(key)
    params = init_params(k_param, llm_size)

    # Temporal scalar feature per (batch, seq) position, shape (B, S, 1).
    x = jax.random.normal(k_x, (batch, seq, 1), jnp.float32)

    ref = _reference(x.reshape(-1, 1), params).reshape(batch, seq, llm_size)

    # 1) default tiling (single grid step at this toy size)
    out = temporal_projector(x, params)
    out = jax.block_until_ready(out)
    assert out.shape == (batch, seq, llm_size)
    # bf16 MXU feed with f32 accumulation -> allow ~1e-2 drift vs f32 reference.
    assert jnp.allclose(out, ref, atol=2e-2, rtol=2e-2), "mismatch vs reference"

    # 2) small tile to exercise the multi-step grid + row-padding path
    out_tiled = temporal_projector(x, params, tile_n=8)
    out_tiled = jax.block_until_ready(out_tiled)
    assert jnp.allclose(out_tiled, ref, atol=2e-2, rtol=2e-2), \
        "mismatch vs reference (tiled path)"

    print("KERNEL_OK")
</pallas_src>

<mosaic_0001>
module attributes {stable_mosaic.version = 11 : i64} {
  func.func @_temporal_projector_kernel(%arg0: i32, %arg1: memref<16x1xf32, #tpu.memory_space<vmem>>, %arg2: memref<1x8xf32, #tpu.memory_space<vmem>>, %arg3: memref<1x8xf32, #tpu.memory_space<vmem>>, %arg4: memref<8x32xbf16, #tpu.memory_space<vmem>>, %arg5: memref<1x32xf32, #tpu.memory_space<vmem>>, %arg6: memref<1x32xf32, #tpu.memory_space<vmem>>, %arg7: memref<1x32xf32, #tpu.memory_space<vmem>>, %arg8: memref<16x32xf32, #tpu.memory_space<vmem>>) attributes {dimension_semantics = [#tpu.dimension_semantics<parallel>], iteration_bounds = array<i64: 1>, scalar_prefetch = 0 : i64, scratch_operands = 0 : i64, tpu.core_type = #tpu.core_type<tc>, window_params = [{transform_indices = @transform_0, window_bounds = array<i64: 16, 1>}, {pipeline_mode = #tpu.pipeline_mode<synchronous>, transform_indices = @transform_1, window_bounds = array<i64: 1, 8>}, {pipeline_mode = #tpu.pipeline_mode<synchronous>, transform_indices = @transform_2, window_bounds = array<i64: 1, 8>}, {pipeline_mode = #tpu.pipeline_mode<synchronous>, transform_indices = @transform_3, window_bounds = array<i64: 8, 32>}, {pipeline_mode = #tpu.pipeline_mode<synchronous>, transform_indices = @transform_4, window_bounds = array<i64: 1, 32>}, {pipeline_mode = #tpu.pipeline_mode<synchronous>, transform_indices = @transform_5, window_bounds = array<i64: 1, 32>}, {pipeline_mode = #tpu.pipeline_mode<synchronous>, transform_indices = @transform_6, window_bounds = array<i64: 1, 32>}, {transform_indices = @transform_7, window_bounds = array<i64: 16, 32>}]} {
    %c0 = arith.constant 0 : index
    %c0_0 = arith.constant 0 : index
    %0 = vector.load %arg1[%c0, %c0_0] : memref<16x1xf32, #tpu.memory_space<vmem>>, vector<16x1xf32>
    %c0_1 = arith.constant 0 : index
    %c0_2 = arith.constant 0 : index
    %1 = vector.load %arg2[%c0_1, %c0_2] : memref<1x8xf32, #tpu.memory_space<vmem>>, vector<1x8xf32>
    %c0_3 = arith.constant 0 : index
    %c0_4 = arith.constant 0 : index
    %2 = vector.load %arg3[%c0_3, %c0_4] : memref<1x8xf32, #tpu.memory_space<vmem>>, vector<1x8xf32>
    %3 = vector.broadcast %0 : vector<16x1xf32> to vector<16x8xf32>
    %4 = vector.broadcast %1 : vector<1x8xf32> to vector<16x8xf32>
    %5 = arith.mulf %3, %4 : vector<16x8xf32>
    %6 = vector.broadcast %2 : vector<1x8xf32> to vector<16x8xf32>
    %7 = arith.addf %5, %6 : vector<16x8xf32>
    %cst = arith.constant 5.000000e-01 : f32
    %8 = vector.broadcast %cst : f32 to vector<16x8xf32>
    %9 = arith.mulf %8, %7 : vector<16x8xf32>
    %cst_5 = arith.constant 0.707106769 : f32
    %10 = vector.broadcast %cst_5 : f32 to vector<16x8xf32>
    %11 = arith.mulf %7, %10 : vector<16x8xf32>
    %12 = math.erf %11 : vector<16x8xf32>
    %cst_6 = arith.constant 1.000000e+00 : f32
    %13 = vector.broadcast %cst_6 : f32 to vector<16x8xf32>
    %14 = arith.addf %13, %12 : vector<16x8xf32>
    %15 = arith.mulf %9, %14 : vector<16x8xf32>
    %16 = arith.truncf %15 : vector<16x8xf32> to vector<16x8xbf16>
    %c0_7 = arith.constant 0 : index
    %c0_8 = arith.constant 0 : index
    %17 = vector.load %arg4[%c0_7, %c0_8] : memref<8x32xbf16, #tpu.memory_space<vmem>>, vector<8x32xbf16>
    %cst_9 = arith.constant dense<0.000000e+00> : vector<16x32xf32>
    %18 = tpu.matmul %16, %17, %cst_9 {dimension_numbers = #tpu.dot_dimension_numbers<[1], [0], [0], [1], [0, 0, 1, 1], [], []>} : vector<16x8xbf16>, vector<8x32xbf16>, vector<16x32xf32> -> vector<16x32xf32>
    %c0_10 = arith.constant 0 : index
    %c0_11 = arith.constant 0 : index
    %19 = vector.load %arg5[%c0_10, %c0_11] : memref<1x32xf32, #tpu.memory_space<vmem>>, vector<1x32xf32>
    %20 = vector.broadcast %19 : vector<1x32xf32> to vector<16x32xf32>
    %21 = arith.addf %18, %20 : vector<16x32xf32>
    %cst_12 = arith.constant dense<0.000000e+00> : vector<16xf32>
    %22 = vector.multi_reduction <add>, %21, %cst_12 [1] : vector<16x32xf32> to vector<16xf32>
    %23 = vector.shape_cast %22 : vector<16xf32> to vector<16x1xf32>
    %cst_13 = arith.constant 3.200000e+01 : f32
    %24 = vector.broadcast %cst_13 : f32 to vector<16x1xf32>
    %25 = arith.divf %23, %24 : vector<16x1xf32>
    %26 = vector.broadcast %25 : vector<16x1xf32> to vector<16x32xf32>
    %27 = arith.subf %21, %26 : vector<16x32xf32>
    %28 = arith.mulf %27, %27 : vector<16x32xf32>
    %cst_14 = arith.constant dense<0.000000e+00> : vector<16xf32>
    %29 = vector.multi_reduction <add>, %28, %cst_14 [1] : vector<16x32xf32> to vector<16xf32>
    %30 = vector.shape_cast %29 : vector<16xf32> to vector<16x1xf32>
    %cst_15 = arith.constant 3.200000e+01 : f32
    %31 = vector.broadcast %cst_15 : f32 to vector<16x1xf32>
    %32 = arith.divf %30, %31 : vector<16x1xf32>
    %cst_16 = arith.constant 9.99999974E-6 : f32
    %33 = vector.broadcast %cst_16 : f32 to vector<16x1xf32>
    %34 = arith.addf %32, %33 : vector<16x1xf32>
    %35 = math.rsqrt %34 : vector<16x1xf32>
    %36 = vector.broadcast %35 : vector<16x1xf32> to vector<16x32xf32>
    %37 = arith.mulf %27, %36 : vector<16x32xf32>
    %c0_17 = arith.constant 0 : index
    %c0_18 = arith.constant 0 : index
    %38 = vector.load %arg6[%c0_17, %c0_18] : memref<1x32xf32, #tpu.memory_space<vmem>>, vector<1x32xf32>
    %39 = vector.broadcast %38 : vector<1x32xf32> to vector<16x32xf32>
    %40 = arith.mulf %37, %39 : vector<16x32xf32>
    %c0_19 = arith.constant 0 : index
    %c0_20 = arith.constant 0 : index
    %41 = vector.load %arg7[%c0_19, %c0_20] : memref<1x32xf32, #tpu.memory_space<vmem>>, vector<1x32xf32>
    %42 = vector.broadcast %41 : vector<1x32xf32> to vector<16x32xf32>
    %43 = arith.addf %40, %42 : vector<16x32xf32>
    %c0_21 = arith.constant 0 : index
    %c0_22 = arith.constant 0 : index
    %44 = vector.load %arg8[%c0_21, %c0_22] : memref<16x32xf32, #tpu.memory_space<vmem>>, vector<16x32xf32>
    tpu.vector_store %arg8[%c0_21, %c0_22], %43 {strides = array<i32>} : memref<16x32xf32, #tpu.memory_space<vmem>>, vector<16x32xf32>,
    return
  }
  func.func @transform_0(%arg0: i32) -> (i32, i32) {
    %c0_i32 = arith.constant 0 : i32
    %c0_i32_0 = arith.constant 0 : i32
    return %arg0, %c0_i32 : i32, i32
  }
  func.func @transform_1(%arg0: i32) -> (i32, i32) {
    %c0_i32 = arith.constant 0 : i32
    %c0_i32_0 = arith.constant 0 : i32
    %c0_i32_1 = arith.constant 0 : i32
    return %c0_i32, %c0_i32_0 : i32, i32
  }
  func.func @transform_2(%arg0: i32) -> (i32, i32) {
    %c0_i32 = arith.constant 0 : i32
    %c0_i32_0 = arith.constant 0 : i32
    %c0_i32_1 = arith.constant 0 : i32
    return %c0_i32, %c0_i32_0 : i32, i32
  }
  func.func @transform_3(%arg0: i32) -> (i32, i32) {
    %c0_i32 = arith.constant 0 : i32
    %c0_i32_0 = arith.constant 0 : i32
    %c0_i32_1 = arith.constant 0 : i32
    return %c0_i32, %c0_i32_0 : i32, i32
  }
  func.func @transform_4(%arg0: i32) -> (i32, i32) {
    %c0_i32 = arith.constant 0 : i32
    %c0_i32_0 = arith.constant 0 : i32
    %c0_i32_1 = arith.constant 0 : i32
    return %c0_i32, %c0_i32_0 : i32, i32
  }
  func.func @transform_5(%arg0: i32) -> (i32, i32) {
    %c0_i32 = arith.constant 0 : i32
    %c0_i32_0 = arith.constant 0 : i32
    %c0_i32_1 = arith.constant 0 : i32
    return %c0_i32, %c0_i32_0 : i32, i32
  }
  func.func @transform_6(%arg0: i32) -> (i32, i32) {
    %c0_i32 = arith.constant 0 : i32
    %c0_i32_0 = arith.constant 0 : i32
    %c0_i32_1 = arith.constant 0 : i32
    return %c0_i32, %c0_i32_0 : i32, i32
  }
  func.func @transform_7(%arg0: i32) -> (i32, i32) {
    %c0_i32 = arith.constant 0 : i32
    %c0_i32_0 = arith.constant 0 : i32
    return %arg0, %c0_i32 : i32, i32
  }
}

</mosaic_0001>

<bundles_post_ra>
// kernel: tpu_custom_call.1
= control target key start
LH: loop header
LB: loop body
LE: loop exit
PB: predicated region body
PF: predicated region fallthrough
CT: control target
= control target key end

     0   :  { %v241_v1 = vmov 0   ;;  %s320_s0 = inlined_call_operand.vmem [shape: f32[16,1], index: 0, kind: input, shape index: {}]   ;;  %s321_s1 = inlined_call_operand.vmem [shape: f32[1,8], index: 1, kind: input, shape index: {}]   ;;  %s322_s2 = inlined_call_operand.vmem [shape: f32[1,8], index: 2, kind: input, shape index: {}]   ;;  %s323_s3 = inlined_call_operand.vmem [shape: bf16[8,32], index: 3, kind: input, shape index: {}]   ;;  %s324_s4 = inlined_call_operand.vmem [shape: f32[1,32], index: 4, kind: input, shape index: {}]   ;;  %s325_s5 = inlined_call_operand.vmem [shape: f32[1,32], index: 5, kind: input, shape index: {}]   ;;  %s326_s6 = inlined_call_operand.vmem [shape: f32[1,32], index: 6, kind: input, shape index: {}]   ;;  %s327_s7 = inlined_call_operand.hbm [shape: f32[16,32], index: 7, kind: output, shape index: {}]  }
   0x1   :  { %v28_v0 = vld [vmem:[%s320_s0] sm:$0xff]  ;;  %210 = vset.pattern.permute.xlu0 %v241_v1 }
   0x2   :  { %12 = vsyncpa [#allocation3], 0  ;;  %34 = vperm.xlu0 %210, %v28_v0   ;;  %v29_v2 = vld [vmem:[%s320_s0 + $0x8] sm:$0xff]  ;;  %v69_v3 = vld [vmem:[%s323_s3] sm:$0xf]  ;;  %vm81_vm0 = vcmask 1043456  }
   0x3   :  { %v242_v4 = vmov 0.0   ;;  %v83_v5 = vsel %vm81_vm0, %v69_v3, 0  ;;  %vm243_vm1 = vmmov 0   ;;  %v190_v6 = vld [vmem:[%s321_s1] ss:$0 sm:$0xff]  ;;  %vm77_vm2 = vcmask 64512  }
   0x4   :  { %198 = vmatprep.subr.bf16.mxu0 %v242_v4  ;;  %200 = vmatprep.mubr.msk.bf16.mxu0 %vm243_vm1, %v242_v4  ;;  %v191_v7 = vld [vmem:[%s322_s2] ss:$0 sm:$0xff]  ;;  %vm126_vm3 = vcmask 261120   ;;  %s244_s12 = smov [#allocation2]  }
   0x5   :  { %199 = vmatpush3.bf16.msra.mxu0 %v83_v5  ;;  %v192_v25 = vld [vmem:[%s324_s4] ss:$0 sm:$0xff]  ;;  %s179_s13 = sshll.u32 %s244_s12, 4  ;;  %s180_s13 = int_to_ptr.vmem [resolvable:$true] %s179_s13 }
   0x6   :  { %39 = vperm.xlu0 %210, %v29_v2   ;;  %v194_v51 = vld [vmem:[%s325_s5] ss:$0 sm:$0xff]  ;;  %s219_s14 = scalar_lea.vmem %s180_s13, 256  ;;  %p224_p1 = scmp.lt.s32.totalorder %s180_s13, %s180_s13 }
   0x7   :  { %v195_v53 = vld [vmem:[%s326_s6] ss:$0 sm:$0xff]  ;;  %p220_p0 = scmp.ne.s32.totalorder %s180_s13, %s219_s14  ;;  %p225_p2 = scmp.lt.s32.totalorder %s219_s14, %s219_s14 }
   0x9   :  { %p226_p3 = por %p225_p2, %p224_p1 }
   0xb   :  { %p227_p4 = pnand %p226_p3, %p220_p0 }
  0x7d   :  { %v35_v8 = vpop.permute.xlu0 %34 }
  0x7e   :  { %v48_v9 = vmul.f32 %v190_v6, %v35_v8 }
  0x80   :  { %v56_v10 = vadd.f32 %v191_v7, %v48_v9 }
  0x81   :  { %v40_v11 = vpop.permute.xlu0 %39 }
  0x82   :  { %v60_v12 = vmul.f32 0.70710677, %v56_v10  ;;  %v49_v13 = vmul.f32 %v190_v6, %v40_v11  ;;  %v58_v19 = vmul.f32 0.5, %v56_v10 }
  0x84   :  { %211 = verf.f32 %v60_v12  ;;  %v57_v14 = vadd.f32 %v191_v7, %v49_v13 }
  0x86   :  { %v61_v15 = vmul.f32 0.70710677, %v57_v14  ;;  %v59_v20 = vmul.f32 0.5, %v57_v14 }
  0x88   :  { %213 = verf.f32 %v61_v15 }
  0x91   :  { %v212_v16 = vpop.eup %211 }
  0x92   :  { %v64_v17 = vadd.f32 1.0, %v212_v16 }
  0x94   :  { %v66_v22 = vmul.f32 %v64_v17, %v58_v19 }
  0x95   :  { %v214_v18 = vpop.eup %213 }
  0x96   :  { %v65_v21 = vadd.f32 1.0, %v214_v18 }
  0x98   :  { %v67_v23 = vmul.f32 %v65_v21, %v59_v20 }
  0x9a   :  { %v68_v24 = vpack.c.bf16 %v67_v23, %v66_v22 }
  0x9c   :  { %201 = vmatmul.mubr.msk.bf16.vlgmr.msra.gmra.mxu0 %vm77_vm2, %v68_v24 }
 0x15c   :  { %v119_v26 = vpop.f32.mrf.mxu0 }
 0x15d   :  { %v120_v27 = vadd.f32 %v192_v25, %v119_v26 }
 0x15e   :  { %v202_v28 = vpop.f32.mrf.mxu0 }
 0x15f   :  { %v127_v29 = vsel %vm126_vm3, %v120_v27, 0.0 }
 0x160   :  { %128 = vadd.xlane.f32.xlu1 %v127_v29  ;;  %v122_v30 = vpop.f32.mrf.mxu0 }
 0x161   :  { %v123_v31 = vadd.f32 %v192_v25, %v122_v30 }
 0x162   :  { %v203_v32 = vpop.f32.mrf.mxu0 }
 0x163   :  { %v130_v33 = vsel %vm126_vm3, %v123_v31, 0.0 }
 0x164   :  { %131 = vadd.xlane.f32.xlu1 %v130_v33 }
 0x1e9   :  { %v129_v34 = vpop.xlane.xlu1 %128 }
 0x1ea   :  { %v134_v35 = vmul.f32 0.03125, %v129_v34 }
 0x1ec   :  { %v136_v36 = vsub.f32 %v120_v27, %v134_v35 }
 0x1ed   :  { %v132_v37 = vpop.xlane.xlu1 %131 }
 0x1ee   :  { %v135_v38 = vmul.f32 0.03125, %v132_v37  ;;  %v138_v39 = vmul.f32 %v136_v36, %v136_v36 }
 0x1f0   :  { %v137_v40 = vsub.f32 %v123_v31, %v135_v38  ;;  %v140_v41 = vsel %vm126_vm3, %v138_v39, 0.0 }
 0x1f1   :  { %141 = vadd.xlane.f32.xlu0 %v140_v41 }
 0x1f2   :  { %v139_v42 = vmul.f32 %v137_v40, %v137_v40 }
 0x1f4   :  { %v143_v43 = vsel %vm126_vm3, %v139_v42, 0.0 }
 0x1f5   :  { %144 = vadd.xlane.f32.xlu1 %v143_v43 }
 0x27a   :  { %v142_v44 = vpop.xlane.xlu0 %141 }
 0x27b   :  { %v146_v45 = vmul.f32 0.03125, %v142_v44 }
 0x27d   :  { %v148_v46 = vadd.f32 1e-05, %v146_v45 }
 0x27e   :  { %v145_v47 = vpop.xlane.xlu1 %144 }
 0x27f   :  { %215 = vrsqrt.f32 %v148_v46  ;;  %v147_v48 = vmul.f32 0.03125, %v145_v47 }
 0x281   :  { %v149_v49 = vadd.f32 1e-05, %v147_v48 }
 0x283   :  { %217 = vrsqrt.f32 %v149_v49 }
 0x28c   :  { %v216_v50 = vpop.eup %215 }
 0x28d   :  { %v152_v52 = vmul.f32 %v216_v50, %v136_v36 }
 0x28f   :  { %v161_v54 = vmul.f32 %v194_v51, %v152_v52 }
 0x290   :  { %v218_v55 = vpop.eup %217 }
 0x291   :  { %v153_v56 = vmul.f32 %v218_v55, %v137_v40  ;;  %v170_v57 = vadd.f32 %v195_v53, %v161_v54 }
 0x293   :  { %v162_v58 = vmul.f32 %v194_v51, %v153_v56  ;;  %172 = vst.msk [vmem:[#allocation2] sm:$0xff] %vm126_vm3, %v170_v57 }
 0x295   :  { %v171_v59 = vadd.f32 %v195_v53, %v162_v58 }
 0x297   :  { %173 = vst.msk [vmem:[#allocation2 + $0x8] sm:$0xff] %vm126_vm3, %v171_v59 }
 0x298   :  { %230 = shalt.err (!%p227_p4)
}
 0x299   :  { %s245_s5 = smov 128   ;;  %s246_s6 = smov 8  }
 0x29a   :  { %185 = dma.vmem_to_hbm [thread:$0]  %s180_s13, 256, %s327_s7, [#allocation3], %s245_s5, %s245_s5, %s246_s6  }
 0x29b   :  { %239 = dma.done.wait [#allocation3], 256  }
 0x29c   :  { %240 = vsyncadd [#allocation3], 4294967040 }
 0x29d   :  { %189 = vsyncpa [#allocation3], 1 }

</bundles_post_ra>
